<compile_context>
chip_gen: v6e
topology: v6e:2x2x1
jax: 0.10.0
libtpu: 0.0.40
codegen_flags: <defaults>
</compile_context>

<pallas_src>
import functools

import jax
import jax.numpy as jnp
from jax.experimental import pallas as pl
from jax.experimental.pallas import tpu as pltpu


def aggr_kernel(D, C, gene_ref, mm_ref, w_ref, misc_ref, out_ref):
    cdt = w_ref.dtype  # compute dtype for MXU operands (f32 or bf16)

    w1a = w_ref[0 * D:1 * D, :]
    w1b = w_ref[1 * D:2 * D, :]
    w2 = w_ref[2 * D:3 * D, :]
    wc = w_ref[3 * D:4 * D, :]          # w3 @ wc, zero-padded to D columns

    # fusion_layer: Linear(2D->D) -> ReLU -> [Dropout=id] -> Linear -> ReLU
    #               -> [Dropout=id] -> Linear, with the last Linear folded into
    # the classifier.  The first Linear on [gene | mm] is two matmuls so the
    # wrapper never materializes the concat.
    h = (jnp.dot(gene_ref[...], w1a, preferred_element_type=jnp.float32)
         + jnp.dot(mm_ref[...], w1b, preferred_element_type=jnp.float32)
         + misc_ref[0:1, :])
    h = jnp.maximum(h, 0.0).astype(cdt)
    h = jnp.dot(h, w2, preferred_element_type=jnp.float32) + misc_ref[1:2, :]
    h = jnp.maximum(h, 0.0).astype(cdt)

    # classifier (with w3 folded in) -> logits (TM, C)
    logits = (jnp.dot(h, wc, preferred_element_type=jnp.float32)
              + misc_ref[2:3, :])[:, 0:C]
    hazards = jax.nn.sigmoid(logits)

    # S = cumprod(1 - hazards) in log space, lane-parallel.
    # log(1 - sigmoid(x)) = -softplus(x): finite even when logits saturate.
    log1mh = -(jnp.maximum(logits, 0.0)
               + jnp.log(1.0 + jnp.exp(-jnp.abs(logits))))
    tri = misc_ref[8:8 + C, 0:C]        # tri[j, i] = 1 iff j <= i
    s = jnp.exp(jnp.dot(log1mh, tri, preferred_element_type=jnp.float32))

    # Single packed store [hazards | S | logits] -> one writeback per tile.
    out_ref[...] = jnp.concatenate([hazards, s, logits], axis=-1)


def aggr_layer(gene_embedding, mm_embedding, params, n_classes, *,
               block_b=1024, compute_dtype=jnp.bfloat16):
    """Pallas forward of AggrLayer.

    gene_embedding / mm_embedding: (D,) single sample (torch semantics) or
    (B, D) batch.  Returns (hazards, S, Y_hat) of shapes (B, C), (B, C), (B, 1).
    """
    gene = jnp.asarray(gene_embedding, jnp.float32)
    mm = jnp.asarray(mm_embedding, jnp.float32)
    if gene.ndim == 1:
        gene, mm = gene[None, :], mm[None, :]
    B, D = gene.shape
    C = n_classes
    if C > D:
        raise ValueError("packed-slab layout assumes n_classes <= embed_dim")

    w1, b1, w2, b2, w3, b3, wc, bc = params
    hi = jax.lax.Precision.HIGHEST

    # Fold the third Linear into the classifier (no nonlinearity in between).
    wc_f = jnp.dot(w3, wc, precision=hi)          # (D, C)
    bc_f = jnp.dot(b3, wc, precision=hi) + bc     # (C,)

    # Resident weight slab: [w1a; w1b; w2; wc' padded to (D, D)].
    wc_pad = jnp.zeros((D, D), jnp.float32).at[:, :C].set(wc_f)
    w_slab = jnp.concatenate([w1[:D], w1[D:], w2, wc_pad],
                             axis=0).astype(compute_dtype)

    # Resident f32 misc slab: biases in rows 0..2, tri at rows 8..8+C-1.
    misc = jnp.zeros((8 + C, D), jnp.float32)
    misc = misc.at[0, :].set(b1)
    misc = misc.at[1, :].set(b2)
    misc = misc.at[2, :C].set(bc_f)
    misc = misc.at[8:8 + C, :C].set(jnp.triu(jnp.ones((C, C), jnp.float32)))

    gene = gene.astype(compute_dtype)
    mm = mm.astype(compute_dtype)

    def ceil_to(x, m):
        return -(-x // m) * m

    # Row tile: multiple of 8 sublanes, capped at block_b, and chosen so the
    # grid has >= 2 tiles whenever B allows (keeps both v7x TensorCores busy).
    TM = min(block_b, max(8, ceil_to(pl.cdiv(B, 2), 8)))
    grid = (pl.cdiv(B, TM),)    # no input padding: partial last block is fine

    def row_spec(ncols):
        return pl.BlockSpec((TM, ncols), lambda i: (i, 0))

    def resident(arr):          # whole array VMEM-resident, same block each step
        return pl.BlockSpec(arr.shape, lambda i: (0, 0))

    packed = pl.pallas_call(
        functools.partial(aggr_kernel, D, C),
        out_shape=jax.ShapeDtypeStruct((B, 3 * C), jnp.float32),
        grid=grid,
        in_specs=[row_spec(D), row_spec(D), resident(w_slab), resident(misc)],
        out_specs=row_spec(3 * C),
        compiler_params=pltpu.CompilerParams(
            dimension_semantics=("parallel",)),   # v7x: row tiles over 2 TCs
    )(gene, mm, w_slab, misc)

    hazards = packed[:, 0:C]
    S = packed[:, C:2 * C]
    logits = packed[:, 2 * C:3 * C]
    # Y_hat = torch.topk(logits, 1, dim=1)[1] (first-occurrence argmax),
    # computed in the wrapper to keep the kernel epilogue to one dense store.
    Y_hat = jnp.argmax(logits, axis=1, keepdims=True).astype(jnp.int32)
    return hazards, S, Y_hat


def init_params(key, embed_dim, n_classes):
    # Deterministic synthetic weights, PyTorch-Linear-style uniform(+-1/sqrt(fan_in)).
    ks = jax.random.split(key, 8)

    def lin(kw, kb, fan_in, fan_out):
        bound = 1.0 / (fan_in ** 0.5)
        w = jax.random.uniform(kw, (fan_in, fan_out), jnp.float32, -bound, bound)
        b = jax.random.uniform(kb, (fan_out,), jnp.float32, -bound, bound)
        return w, b

    w1, b1 = lin(ks[0], ks[1], 2 * embed_dim, embed_dim)
    w2, b2 = lin(ks[2], ks[3], embed_dim, embed_dim)
    w3, b3 = lin(ks[4], ks[5], embed_dim, embed_dim)
    wc, bc = lin(ks[6], ks[7], embed_dim, n_classes)
    return (w1, b1, w2, b2, w3, b3, wc, bc)


def reference(gene, mm, params):
    # Pure-JAX reference of the torch forward (f32 HIGHEST-precision matmuls).
    w1, b1, w2, b2, w3, b3, wc, bc = params
    dot = functools.partial(jnp.dot, precision=jax.lax.Precision.HIGHEST)
    x = jnp.concatenate([gene, mm], axis=-1)
    if x.ndim == 1:
        x = x[None, :]
    h = jax.nn.relu(dot(x, w1) + b1)
    h = jax.nn.relu(dot(h, w2) + b2)
    feat = dot(h, w3) + b3
    logits = dot(feat, wc) + bc
    hazards = jax.nn.sigmoid(logits)
    S = jnp.cumprod(1.0 - hazards, axis=1)
    yhat = jnp.argmax(logits, axis=1, keepdims=True).astype(jnp.int32)
    return hazards, S, yhat


if __name__ == "__main__":
    embed_dim = 32
    n_classes = 4
    batch = 16

    key = jax.random.PRNGKey(0)
    k_gene, k_mm, k_params = jax.random.split(key, 3)
    gene_b = jax.random.normal(k_gene, (batch, embed_dim), jnp.float32)
    mm_b = jax.random.normal(k_mm, (batch, embed_dim), jnp.float32)
    params = init_params(k_params, embed_dim, n_classes)

    h_ref, s_ref, y_ref = reference(gene_b, mm_b, params)

    # f32 path: tight check against the HIGHEST-precision reference
    # (TM=8 -> 2 row tiles on the "parallel" grid axis).
    hazards, S, Y_hat = aggr_layer(gene_b, mm_b, params, n_classes,
                                   compute_dtype=jnp.float32)
    jax.block_until_ready((hazards, S, Y_hat))
    assert hazards.shape == (batch, n_classes)
    assert S.shape == (batch, n_classes)
    assert Y_hat.shape == (batch, 1)
    assert jnp.allclose(hazards, h_ref, rtol=1e-5, atol=1e-5)
    assert jnp.allclose(S, s_ref, rtol=1e-5, atol=1e-5)
    assert jnp.array_equal(Y_hat, y_ref)

    # bf16 default path: halves activation/weight HBM bytes; accumulation,
    # biases and all elementwise math stay f32.
    hb, sb, yb = aggr_layer(gene_b, mm_b, params, n_classes)
    jax.block_until_ready((hb, sb, yb))
    assert hb.shape == (batch, n_classes) and sb.shape == (batch, n_classes)
    assert yb.shape == (batch, 1) and yb.dtype == jnp.int32
    assert jnp.allclose(hb, h_ref, rtol=5e-2, atol=5e-2)
    assert jnp.allclose(sb, s_ref, rtol=5e-2, atol=5e-2)
    # (No exact Y_hat check on the bf16 path: rounding can legitimately flip
    #  near-tied logits.)

    # Single-sample call: original torch-module semantics, shapes (1,C)/(1,1),
    # exercising an unpadded partial (1-of-8 rows) block.
    h1, s1, y1 = aggr_layer(gene_b[0], mm_b[0], params, n_classes,
                            compute_dtype=jnp.float32)
    jax.block_until_ready((h1, s1, y1))
    assert h1.shape == (1, n_classes) and s1.shape == (1, n_classes)
    assert y1.shape == (1, 1)
    assert jnp.allclose(h1, h_ref[0:1], rtol=1e-5, atol=1e-5)
    assert jnp.allclose(s1, s_ref[0:1], rtol=1e-5, atol=1e-5)
    assert int(y1[0, 0]) == int(y_ref[0, 0])

    print("KERNEL_OK")
</pallas_src>

<mosaic_0001>
module attributes {stable_mosaic.version = 11 : i64} {
  func.func @aggr_kernel(%arg0: i32, %arg1: memref<8x32xf32, #tpu.memory_space<vmem>>, %arg2: memref<8x32xf32, #tpu.memory_space<vmem>>, %arg3: memref<128x32xf32, #tpu.memory_space<vmem>>, %arg4: memref<12x32xf32, #tpu.memory_space<vmem>>, %arg5: memref<8x12xf32, #tpu.memory_space<vmem>>) attributes {dimension_semantics = [#tpu.dimension_semantics<parallel>], iteration_bounds = array<i64: 2>, scalar_prefetch = 0 : i64, scratch_operands = 0 : i64, tpu.core_type = #tpu.core_type<tc>, window_params = [{transform_indices = @transform_0, window_bounds = array<i64: 8, 32>}, {transform_indices = @transform_1, window_bounds = array<i64: 8, 32>}, {pipeline_mode = #tpu.pipeline_mode<synchronous>, transform_indices = @transform_2, window_bounds = array<i64: 128, 32>}, {pipeline_mode = #tpu.pipeline_mode<synchronous>, transform_indices = @transform_3, window_bounds = array<i64: 12, 32>}, {transform_indices = @transform_4, window_bounds = array<i64: 8, 12>}]} {
    %c0 = arith.constant 0 : index
    %c0_0 = arith.constant 0 : index
    %0 = vector.load %arg3[%c0, %c0_0] : memref<128x32xf32, #tpu.memory_space<vmem>>, vector<32x32xf32>
    %c32 = arith.constant 32 : index
    %c0_1 = arith.constant 0 : index
    %1 = vector.load %arg3[%c32, %c0_1] : memref<128x32xf32, #tpu.memory_space<vmem>>, vector<32x32xf32>
    %c64 = arith.constant 64 : index
    %c0_2 = arith.constant 0 : index
    %2 = vector.load %arg3[%c64, %c0_2] : memref<128x32xf32, #tpu.memory_space<vmem>>, vector<32x32xf32>
    %c96 = arith.constant 96 : index
    %c0_3 = arith.constant 0 : index
    %3 = vector.load %arg3[%c96, %c0_3] : memref<128x32xf32, #tpu.memory_space<vmem>>, vector<32x32xf32>
    %c0_4 = arith.constant 0 : index
    %c0_5 = arith.constant 0 : index
    %4 = vector.load %arg1[%c0_4, %c0_5] : memref<8x32xf32, #tpu.memory_space<vmem>>, vector<8x32xf32>
    %cst = arith.constant dense<0.000000e+00> : vector<8x32xf32>
    %5 = tpu.matmul %4, %0, %cst {dimension_numbers = #tpu.dot_dimension_numbers<[1], [0], [0], [1], [0, 0, 1, 1], [], []>} : vector<8x32xf32>, vector<32x32xf32>, vector<8x32xf32> -> vector<8x32xf32>
    %c0_6 = arith.constant 0 : index
    %c0_7 = arith.constant 0 : index
    %6 = vector.load %arg2[%c0_6, %c0_7] : memref<8x32xf32, #tpu.memory_space<vmem>>, vector<8x32xf32>
    %cst_8 = arith.constant dense<0.000000e+00> : vector<8x32xf32>
    %7 = tpu.matmul %6, %1, %cst_8 {dimension_numbers = #tpu.dot_dimension_numbers<[1], [0], [0], [1], [0, 0, 1, 1], [], []>} : vector<8x32xf32>, vector<32x32xf32>, vector<8x32xf32> -> vector<8x32xf32>
    %8 = arith.addf %5, %7 : vector<8x32xf32>
    %c0_9 = arith.constant 0 : index
    %c0_10 = arith.constant 0 : index
    %9 = vector.load %arg4[%c0_9, %c0_10] : memref<12x32xf32, #tpu.memory_space<vmem>>, vector<1x32xf32>
    %10 = vector.broadcast %9 : vector<1x32xf32> to vector<8x32xf32>
    %11 = arith.addf %8, %10 : vector<8x32xf32>
    %cst_11 = arith.constant 0.000000e+00 : f32
    %12 = vector.broadcast %cst_11 : f32 to vector<8x32xf32>
    %13 = arith.maximumf %11, %12 : vector<8x32xf32>
    %cst_12 = arith.constant dense<0.000000e+00> : vector<8x32xf32>
    %14 = tpu.matmul %13, %2, %cst_12 {dimension_numbers = #tpu.dot_dimension_numbers<[1], [0], [0], [1], [0, 0, 1, 1], [], []>} : vector<8x32xf32>, vector<32x32xf32>, vector<8x32xf32> -> vector<8x32xf32>
    %c1 = arith.constant 1 : index
    %c0_13 = arith.constant 0 : index
    %15 = vector.load %arg4[%c1, %c0_13] : memref<12x32xf32, #tpu.memory_space<vmem>>, vector<1x32xf32>
    %16 = vector.broadcast %15 : vector<1x32xf32> to vector<8x32xf32>
    %17 = arith.addf %14, %16 : vector<8x32xf32>
    %cst_14 = arith.constant 0.000000e+00 : f32
    %18 = vector.broadcast %cst_14 : f32 to vector<8x32xf32>
    %19 = arith.maximumf %17, %18 : vector<8x32xf32>
    %cst_15 = arith.constant dense<0.000000e+00> : vector<8x32xf32>
    %20 = tpu.matmul %19, %3, %cst_15 {dimension_numbers = #tpu.dot_dimension_numbers<[1], [0], [0], [1], [0, 0, 1, 1], [], []>} : vector<8x32xf32>, vector<32x32xf32>, vector<8x32xf32> -> vector<8x32xf32>
    %c2 = arith.constant 2 : index
    %c0_16 = arith.constant 0 : index
    %21 = vector.load %arg4[%c2, %c0_16] : memref<12x32xf32, #tpu.memory_space<vmem>>, vector<1x32xf32>
    %22 = vector.broadcast %21 : vector<1x32xf32> to vector<8x32xf32>
    %23 = arith.addf %20, %22 : vector<8x32xf32>
    %24 = vector.extract_strided_slice %23 {offsets = [0, 0], sizes = [8, 4], strides = [1, 1]} : vector<8x32xf32> to vector<8x4xf32>
    %25 = arith.negf %24 : vector<8x4xf32>
    %26 = math.exp %25 : vector<8x4xf32>
    %cst_17 = arith.constant 1.000000e+00 : f32
    %27 = vector.broadcast %cst_17 : f32 to vector<8x4xf32>
    %28 = arith.addf %27, %26 : vector<8x4xf32>
    %29 = arith.divf %27, %28 : vector<8x4xf32>
    %cst_18 = arith.constant 0.000000e+00 : f32
    %30 = vector.broadcast %cst_18 : f32 to vector<8x4xf32>
    %31 = arith.maximumf %24, %30 : vector<8x4xf32>
    %32 = math.absf %24 : vector<8x4xf32>
    %cst_19 = arith.constant 0.000000e+00 : f32
    %33 = vector.broadcast %cst_19 : f32 to vector<8x4xf32>
    %34 = arith.subf %33, %32 : vector<8x4xf32>
    %35 = math.exp %34 : vector<8x4xf32>
    %cst_20 = arith.constant 1.000000e+00 : f32
    %36 = vector.broadcast %cst_20 : f32 to vector<8x4xf32>
    %37 = arith.addf %36, %35 : vector<8x4xf32>
    %38 = math.log %37 : vector<8x4xf32>
    %39 = arith.addf %31, %38 : vector<8x4xf32>
    %cst_21 = arith.constant 0.000000e+00 : f32
    %40 = vector.broadcast %cst_21 : f32 to vector<8x4xf32>
    %41 = arith.subf %40, %39 : vector<8x4xf32>
    %c8 = arith.constant 8 : index
    %c0_22 = arith.constant 0 : index
    %42 = vector.load %arg4[%c8, %c0_22] : memref<12x32xf32, #tpu.memory_space<vmem>>, vector<4x4xf32>
    %cst_23 = arith.constant dense<0.000000e+00> : vector<8x4xf32>
    %43 = tpu.matmul %41, %42, %cst_23 {dimension_numbers = #tpu.dot_dimension_numbers<[1], [0], [0], [1], [0, 0, 1, 1], [], []>} : vector<8x4xf32>, vector<4x4xf32>, vector<8x4xf32> -> vector<8x4xf32>
    %44 = math.exp %43 : vector<8x4xf32>
    %45 = tpu.concatenate %29, %44, %24 in 1 : vector<8x4xf32>, vector<8x4xf32>, vector<8x4xf32> -> vector<8x12xf32>
    %c0_24 = arith.constant 0 : index
    %c0_25 = arith.constant 0 : index
    %46 = vector.load %arg5[%c0_24, %c0_25] : memref<8x12xf32, #tpu.memory_space<vmem>>, vector<8x12xf32>
    tpu.vector_store %arg5[%c0_24, %c0_25], %45 {strides = array<i32>} : memref<8x12xf32, #tpu.memory_space<vmem>>, vector<8x12xf32>,
    return
  }
  func.func @transform_0(%arg0: i32) -> (i32, i32) {
    %c0_i32 = arith.constant 0 : i32
    %c0_i32_0 = arith.constant 0 : i32
    return %arg0, %c0_i32 : i32, i32
  }
  func.func @transform_1(%arg0: i32) -> (i32, i32) {
    %c0_i32 = arith.constant 0 : i32
    %c0_i32_0 = arith.constant 0 : i32
    return %arg0, %c0_i32 : i32, i32
  }
  func.func @transform_2(%arg0: i32) -> (i32, i32) {
    %c0_i32 = arith.constant 0 : i32
    %c0_i32_0 = arith.constant 0 : i32
    %c0_i32_1 = arith.constant 0 : i32
    return %c0_i32, %c0_i32_0 : i32, i32
  }
  func.func @transform_3(%arg0: i32) -> (i32, i32) {
    %c0_i32 = arith.constant 0 : i32
    %c0_i32_0 = arith.constant 0 : i32
    %c0_i32_1 = arith.constant 0 : i32
    return %c0_i32, %c0_i32_0 : i32, i32
  }
  func.func @transform_4(%arg0: i32) -> (i32, i32) {
    %c0_i32 = arith.constant 0 : i32
    %c0_i32_0 = arith.constant 0 : i32
    return %arg0, %c0_i32 : i32, i32
  }
}

</mosaic_0001>

<bundles_post_ra>
// kernel: tpu_custom_call.1
= control target key start
LH: loop header
LB: loop body
LE: loop exit
PB: predicated region body
PF: predicated region fallthrough
CT: control target
= control target key end

     0   :  { %9 = vsyncpa [#allocation3], 0  ;;  %s1160_s0 = inlined_call_operand.vmem [shape: f32[16,32], index: 0, kind: input, shape index: {}]   ;;  %s1161_s1 = inlined_call_operand.vmem [shape: f32[16,32], index: 1, kind: input, shape index: {}]   ;;  %s1162_s2 = inlined_call_operand.vmem [shape: f32[128,32], index: 2, kind: input, shape index: {}]   ;;  %s1163_s3 = inlined_call_operand.vmem [shape: f32[12,32], index: 3, kind: input, shape index: {}]   ;;  %s1164_s4 = inlined_call_operand.hbm [shape: f32[16,12], index: 4, kind: output, shape index: {}]  }
   0x1   :  { %11 = vsyncpa [#allocation3 + $0x1], 0  ;;  %s971_s15 = smov 0   ;;  %s973_s16 = smov 0  }
   0x2   :  { %s975_s17 = smov 0   ;;  %s977_s18 = smov 0  }
   0x3 LB: > { %s992_s19 = sadd.s32 4294967295, %s939_s18   ;;  %s734_s20 = sadd.s32 4294967294, %s939_s18   ;;  %s939_s18 = sphi %s977_s18, %s1170_s18   ;;  %s935_s17 = sphi %s975_s17, %s1169_s17   ;;  %s931_s16 = sphi %s973_s16, %s1168_s16   ;;  %s927_s15 = sphi %s971_s15, %s1167_s15  }
   0x4   : > { %s996_s21 = sadd.s32 1, %s939_s18   ;;  %s118_s22 = sadd.s32 1, %s935_s17 }
   0x5   : > { %s115_s23 = ssub.s32 %s939_s18, %s996_s21  ;;  %p128_p0 = scmp.ne.s32.totalorder %s935_s17, %s931_s16 }
   0x6   : > { %p116_p1 = scmp.eq.s32.totalorder %s115_s23, 0  ;;  %p129_p2 = scmp.eq.s32.totalorder %s992_s19, 1 }
   0x7   : > { %p134_p3 = scmp.ne.s32.totalorder %s931_s16, %s927_s15  ;;  %p135_p4 = scmp.eq.s32.totalorder %s734_s20, 1 }
   0x8   : > { %s1007_s24 = scalar_select %p116_p1, %s935_s17, %s118_s22  }
   0x9   : > { %p1009_p5 = por %p129_p2, %p128_p0  ;;  %p1013_p6 = por %p135_p4, %p134_p3 }
   0xa   : > { %p737_p7 = scmp.ge.s32.totalorder %s939_s18, 1  ;;  %p173_p8 = scmp.lt.s32.totalorder %s939_s18, 3 }
   0xc   : > { %p174_p9 = pnand %p737_p7, %p173_p8 }
   0xd   : > { %p202_p10 = scmp.lt.s32.totalorder (!%p174_p9), %s992_s19, 1  ;;  %s943_s20 = smov (!%p174_p9), 4  }
   0xe   : > { %177 = sbr.rel (%p174_p9) target bundleno = 1004 (0x3ec), region = 36  ;;  %s944_s22 = smov (!%p174_p9), 8  }
   0xf   : > { %s199_s23 = sand.u32 (!%p174_p9), 1, %s931_s16  }
  0x10   : > { %s738_s27 = sshll.u32 (!%p174_p9), %s199_s23, 3  ;;  %s650_s8 = scalar_lea.sflag (!%p174_p9), [#allocation3], %s199_s23 }
  0x11   : > { %s201_s29 = scalar_lea.vmem (!%p174_p9), [#allocation2], %s738_s27 }
  0x12   : > { %s663_s30 = sshll.u32 (!%p174_p9), %s201_s29, 4  ;;  %s664_s30 = int_to_ptr.vmem [resolvable:$true] %s663_s30 }
  0x13   : > { %v217_v0 = vld [vmem:[%s1162_s2 + $0x38] sm:$0xff]  ;;  %v941_v2 = vmov 0.0   ;;  %v216_v3 = vld [vmem:[%s1162_s2 + $0x30] sm:$0xff]  ;;  %s203_s9 = scalar_select %p202_p10, %s992_s19, 1  ;;  %v215_v5 = vld [vmem:[%s1162_s2 + $0x28] sm:$0xff]  ;;  %vm228_vm0 = vcmask 261120  }
  0x14   : > { %v213_v1 = vld [vmem:[%s1162_s2 + $0x18] sm:$0xff]  ;;  %777 = vmatprep.subr.mxu0 %v941_v2  ;;  %788 = vmatprep.subr.mxu1 %v941_v2  ;;  %v212_v4 = vld [vmem:[%s1162_s2 + $0x10] sm:$0xff]  ;;  %v211_v6 = vld [vmem:[%s1162_s2 + $0x8] sm:$0xff]  ;;  %vm942_vm1 = vmmov 0   ;;  %vm560_vm2 = vcmask 1043456   ;;  %vm556_vm3 = vcmask 31744  }
  0x15   : > { %778 = vmatpush3.msra.mxu0 %v217_v0  ;;  %789 = vmatpush3.msra.mxu1 %v213_v1  ;;  %s739_s14 = sshll.u32 %s203_s9, 3  ;;  %v214_v7 = vld [vmem:[%s1162_s2 + $0x20] sm:$0xff]  ;;  %v221_v11 = vld [vmem:[%s1162_s2 + $0x58] sm:$0xff]  ;;  %v220_v12 = vld [vmem:[%s1162_s2 + $0x50] sm:$0xff]  ;;  %vm645_vm4 = vcmask 64512   ;;  %vm647_vm5 = vcmask 97280  }
  0x16   : > { %779 = vmatprep.subr.mxu0 %v941_v2  ;;  %790 = vmatprep.subr.mxu1 %v941_v2  ;;  %s209_s28 = scalar_lea.vmem %s1161_s1, %s739_s14  ;;  %s205_s5 = scalar_lea.vmem %s1160_s0, %s739_s14  ;;  %v210_v8 = vld [vmem:[%s1162_s2] sm:$0xff]  ;;  %v219_v13 = vld [vmem:[%s1162_s2 + $0x48] sm:$0xff]  ;;  %v225_v15 = vld [vmem:[%s1162_s2 + $0x78] sm:$0xff] }
  0x17   : > { %780 = vmatpush3.msra.mxu0 %v216_v3  ;;  %791 = vmatpush3.msra.mxu1 %v212_v4  ;;  %v227_v9 = vld [vmem:[%s209_s28] sm:$0xff]  ;;  %v224_v24 = vld [vmem:[%s1162_s2 + $0x70] sm:$0xff]  ;;  %v223_v25 = vld [vmem:[%s1162_s2 + $0x68] sm:$0xff]  ;;  %s752_s28 = sshll.u32 %s992_s19, 7  ;;  %s879_s9 = scalar_lea.vmem %s664_s30, 128 }
  0x18   : > { %781 = vmatprep.subr.mxu0 %v941_v2  ;;  %792 = vmatprep.subr.mxu1 %v941_v2  ;;  %v226_v10 = vld [vmem:[%s205_s5] sm:$0xff]  ;;  %v555_v32 = vld [vmem:[%s1163_s3 + $0x8] sm:$0xf]  ;;  %s1125_s7 = scalar_lea.hbm %s1164_s4, %s752_s28  ;;  %p880_p11 = scmp.ne.s32.totalorder %s664_s30, %s879_s9 }
  0x19   : > { %782 = vmatpush3.msra.mxu0 %v215_v5  ;;  %793 = vmatpush3.msra.mxu1 %v211_v6  ;;  %v218_v14 = vld [vmem:[%s1162_s2 + $0x40] sm:$0xff]  ;;  %s945_s19 = smov [#allocation2]  }
  0x1a   : > { %783 = vmatprep.subr.mxu0 %v941_v2  ;;  %794 = vmatprep.subr.mxu1 %v941_v2  ;;  %v743_v18 = vld [vmem:[%s1163_s3] ss:$0 sm:$0xff]  ;;  %v744_v27 = vld [vmem:[%s1163_s3 + $0x1] ss:$0 sm:$0xff]  ;;  %v746_v33 = vld [vmem:[%s1163_s3 + $0x2] ss:$0 sm:$0xff]  ;;  %p881_p12 = pnand %p880_p11, %p1009_p5 }
  0x1b   : > { %784 = vmatpush3.msra.mxu0 %v214_v7  ;;  %785 = vmatprep.mubr.msk.f32.mxu0 %vm942_vm1, %v941_v2  ;;  %v222_v26 = vld [vmem:[%s1162_s2 + $0x60] sm:$0xff]  ;;  %s883_s10 = sshll.u32 %s945_s19, 4  ;;  %s884_s10 = int_to_ptr.vmem [resolvable:$false] %s883_s10 }
  0x1c   : > { %795 = vmatpush3.msra.mxu1 %v210_v8  ;;  %796 = vmatprep.mubr.msk.f32.mxu1 %vm942_vm1, %v941_v2  ;;  %p882_p13 = pneg %p881_p12  ;;  %s885_s11 = scalar_lea.vmem %s884_s10, 256 }
  0x1d   : > { %786 = vmatmul.mubr.msk.f32.vlgmr.msra.gmra.mxu0 %vm228_vm0, %v227_v9  ;;  %797 = vmatmul.mubr.msk.f32.vlgmr.msra.gmra.mxu1 %vm228_vm0, %v226_v10  ;;  %p886_p0 = scmp.lt.s32.totalorder %s664_s30, %s884_s10  ;;  %p887_p1 = scmp.lt.s32.totalorder %s885_s11, %s879_s9 }
  0x1e   : > { %799 = vmatprep.subr.mxu0 %v941_v2  ;;  %807 = vmatprep.mubr.msk.f32.mxu0 %vm942_vm1, %v941_v2 }
  0x1f   : > { %810 = vmatprep.subr.mxu1 %v941_v2  ;;  %818 = vmatprep.mubr.msk.f32.mxu1 %vm942_vm1, %v941_v2  ;;  %p888_p2 = por %p887_p1, %p886_p0 }
  0x20   : > { %800 = vmatpush3.msra.mxu0 %v221_v11  ;;  %811 = vmatpush3.msra.mxu1 %v225_v15 }
  0x21   : > { %801 = vmatprep.subr.mxu0 %v941_v2  ;;  %812 = vmatprep.subr.mxu1 %v941_v2  ;;  %p889_p3 = pnand %p888_p2, %p882_p13 }
  0x22   : > { %802 = vmatpush3.msra.mxu0 %v220_v12  ;;  %813 = vmatpush3.msra.mxu1 %v224_v24 }
  0x23   : > { %803 = vmatprep.subr.mxu0 %v941_v2  ;;  %814 = vmatprep.subr.mxu1 %v941_v2 }
  0x24   : > { %804 = vmatpush3.msra.mxu0 %v219_v13  ;;  %815 = vmatpush3.msra.mxu1 %v223_v25 }
  0x25   : > { %805 = vmatprep.subr.mxu0 %v941_v2  ;;  %816 = vmatprep.subr.mxu1 %v941_v2 }
  0x26   : > { %806 = vmatpush3.msra.mxu0 %v218_v14  ;;  %817 = vmatpush3.msra.mxu1 %v222_v26 }
  0x27   : > { %821 = vmatprep.subr.mxu0 %v941_v2 }
  0xdd   : > { %v298_v16 = vpop.f32.mrf.mxu0  ;;  %v371_v17 = vpop.f32.mrf.mxu1 }
  0xde   : > { %v372_v19 = vadd.f32 %v371_v17, %v298_v16 }
  0xdf   : > { %v787_v20 = vpop.f32.mrf.mxu0  ;;  %v798_v21 = vpop.f32.mrf.mxu1 }
  0xe0   : > { %v380_v22 = vadd.f32 %v743_v18, %v372_v19 }
  0xe2   : > { %v381_v23 = vmax.f32 %v380_v22, 0.0 }
  0xe4   : > { %808 = vmatmul.mubr.msk.f32.vlgmr.msra.gmra.mxu0 %vm228_vm0, %v381_v23 }
  0xe5   : > { %823 = vmatprep.mubr.msk.f32.mxu0 %vm942_vm1, %v941_v2  ;;  %822 = vmatpush3.msk.msra.mxu0 %vm560_vm2, %v555_v32 }
 0x1a4   : > { %v456_v28 = vpop.f32.mrf.mxu0 }
 0x1a5   : > { %v457_v29 = vadd.f32 %v744_v27, %v456_v28 }
 0x1a6   : > { %v809_v30 = vpop.f32.mrf.mxu0 }
 0x1a7   : > { %v460_v31 = vmax.f32 %v457_v29, 0.0 }
 0x1a9   : > { %819 = vmatmul.mubr.msk.f32.vlgmr.msra.gmra.mxu1 %vm228_vm0, %v460_v31 }
 0x269   : > { %v535_v34 = vpop.f32.mrf.mxu1 }
 0x26a   : > { %v536_v35 = vadd.f32 %v746_v33, %v535_v34 }
 0x26b   : > { %v820_v36 = vpop.f32.mrf.mxu1 }
 0x26c   : > { %v546_v37 = vand.u32 2147483647, %v536_v35  ;;  %v545_v43 = vmax.f32 %v536_v35, 0.0  ;;  %v748_v51 = vmul.f32 -1.442695, %v536_v35 }
 0x26e   : > { %v547_v38 = vsub.f32 0.0, %v546_v37 }
 0x270   : > { %v548_v39 = vmul.f32 1.442695, %v547_v38 }
 0x272   : > { %869 = vpow2.f32 %v548_v39 }
 0x27f   : > { %v870_v40 = vpop.eup %869 }
 0x280   : > { %v550_v41 = vadd.f32 1.0, %v870_v40 }
 0x282   : > { %871 = vlog2.f32 %v550_v41 }
 0x28f   : > { %v872_v42 = vpop.eup %871 }
 0x290   : > { %v552_v44 = vmul.f32 0.6931472, %v872_v42 }
 0x292   : > { %v553_v45 = vadd.f32 %v552_v44, %v545_v43 }
 0x294   : > { %v554_v46 = vsub.f32 0.0, %v553_v45 }
 0x296   : > { %824 = vmatmul.mubr.msk.f32.vlgmr.msra.gmra.mxu0 %vm556_vm3, %v554_v46 }
 0x356   : > { %v630_v47 = vpop.f32.mrf.mxu0 }
 0x357   : > { %v634_v48 = vmul.f32 1.442695, %v630_v47 }
 0x358   : > { %v825_v49 = vpop.f32.mrf.mxu0 }
 0x359   : > { %873 = vpow2.f32 %v634_v48 }
 0x35a   : > { %875 = vpow2.f32 %v748_v51 }
 0x366   : > { %v874_v50 = vpop.eup %873 }
 0x367   : > { %637 = vrot.lane.b32.xlu0 %v874_v50, %s943_s20  ;;  %v876_v52 = vpop.eup %875 }
 0x368   : > { %v542_v53 = vadd.f32 1.0, %v876_v52 }
 0x36a   : > { %877 = vrcp.f32 %v542_v53 }
 0x36b   : > { %641 = vrot.lane.b32.xlu0 %v536_v35, %s944_s22 }
 0x377   : > { %v878_v55 = vpop.eup %877 }
 0x3d9   : > { %v638_v54 = vpop.permute.xlu0 %637 }
 0x3da   : > { %v644_v56 = vsel %vm556_vm3, %v878_v55, %v638_v54 }
 0x3dd   : > { %v642_v57 = vpop.permute.xlu0 %641 }
 0x3de   : > { %v646_v58 = vsel %vm645_vm4, %v644_v56, %v642_v57 }
 0x3df   : > { %648 = vst.msk [vmem:[%s201_s29] sm:$0xff] %vm647_vm5, %v646_v58 }
 0x3e0   : > { %892 = shalt.err (!%p889_p3)
}
 0x3e1   : > { %s893_s12 = scalar_lea.hbm %s1125_s7, 128  ;;  %s897_s20 = scalar_lea.hbm %s1164_s4, 256 }
 0x3e2   : > { %p894_p4 = scmp.ne.s32.totalorder %s1125_s7, %s893_s12  ;;  %p898_p9 = scmp.lt.s32.totalorder %s1125_s7, %s1164_s4 }
 0x3e3   : > { %p899_p10 = scmp.lt.s32.totalorder %s897_s20, %s893_s12 }
 0x3e4   : > { %p895_p7 = pnand %p894_p4, %p1009_p5 }
 0x3e5   : > { %p900_p11 = por %p899_p10, %p898_p9 }
 0x3e6   : > { %p896_p8 = pneg %p895_p7 }
 0x3e8   : > { %p901_p12 = pnand %p900_p11, %p896_p8 }
 0x3ea   : > { %904 = shalt.err (!%p901_p12)
}
 0x3eb   : > { %826 = dma.vmem_to_hbm [thread:$0]  (%p1009_p5), %s664_s30, 128, %s1125_s7, %s650_s8  }
 0x3ec PF: > { %p832_p13 = scmp.ge.s32.totalorder %s939_s18, 2  ;;  %s675_s27 = sand.u32 1, %s927_s15  }
 0x3ed   : > { %s676_s28 = scalar_lea.sflag [#allocation3], %s675_s27 }
 0x3ee   : > { %p829_p0 = pnand %p832_p13, %p1013_p6 }
 0x3f0   : > { %p830_p1 = pneg %p829_p0 }
 0x3f2   : > { %922 = dma.done.wait (%p830_p1), %s676_s28, 128  }
 0x3f3   : > { %924 = vsyncadd (%p830_p1), %s676_s28, 4294967168  ;;  %p14_p2 = scmp.ge.s32.totalorder %s996_s21, 4   ;;  %s1167_s15 = smov %s931_s16 }
 0x3f4   : > { %s1168_s16 = smov %s935_s17  ;;  %s1169_s17 = smov %s1007_s24 }
 0x3f5   : > { %s1170_s18 = smov %s996_s21  ;;  %16 = sbr.rel (!%p14_p2) target bundleno = 3 (0x3), region = 74 }
 0x3fa   :  { %681 = vsyncpa [#allocation3], 1 }
 0x3fb   :  { %683 = vsyncpa [#allocation3 + $0x1], 1 }

</bundles_post_ra>
